<compile_context>
chip_gen: v5e
topology: v5e:2x2
jax: 0.10.0
libtpu: 0.0.40
codegen_flags: <defaults>
</compile_context>

<pallas_src>
import jax
import jax.numpy as jnp
from jax.experimental import pallas as pl
from jax.experimental.pallas import tpu as pltpu

STATE_DIM = 32
HIDDEN_DIM1 = 128
HIDDEN_DIM2 = 128
ACTION_DIM = 4
DEFAULT_BLOCK_B = 4096  # max batch-tile rows per grid step


def _round_up(n, m):
    return ((n + m - 1) // m) * m


def qnet_kernel(x_ref, w1_ref, b1_ref, w2_ref, b2_ref, w3_ref, b3_ref, o_ref):
    # fc1 + ReLU (LHS cast to weight dtype -> bf16 MXU path when params are bf16)
    x = x_ref[...]
    h1 = jnp.dot(x.astype(w1_ref.dtype), w1_ref[...],
                 preferred_element_type=jnp.float32)
    h1 = jnp.maximum(h1 + b1_ref[...], 0.0)

    # fc2 + sigmoid via tanh: sigmoid(z) == 0.5*(tanh(z/2)+1), single EUP op per vreg
    z2 = jnp.dot(h1.astype(w2_ref.dtype), w2_ref[...],
                 preferred_element_type=jnp.float32)
    z2 = z2 + b2_ref[...]
    h2 = 0.5 * (jnp.tanh(0.5 * z2) + 1.0)

    # fc3 (no activation); output is the true 4-wide Q-value block (no lane padding)
    out = jnp.dot(h2.astype(w3_ref.dtype), w3_ref[...],
                  preferred_element_type=jnp.float32)
    o_ref[...] = (out + b3_ref[...]).astype(o_ref.dtype)


def qnet_forward(x, params, *, block_b=DEFAULT_BLOCK_B):
    """x: (B, STATE_DIM) f32.  params: (w1,b1,w2,b2,w3,b3) with W stored (in, out)."""
    w1, b1, w2, b2, w3, b3 = params
    # biases pre-cast once so the kernel adds f32 directly every grid step
    b1 = b1.astype(jnp.float32)
    b2 = b2.astype(jnp.float32)
    b3 = b3.astype(jnp.float32)

    B = x.shape[0]
    # tile: sublane-aligned (multiple of 8), capped by block_b, and <= ceil(B/2)
    # so the grid has >=2 steps whenever B > 8 (v7x megacore gets both cores busy).
    tb = max(8, min(block_b, _round_up(pl.cdiv(max(B, 1), 2), 8)))
    grid = (pl.cdiv(B, tb),)  # partial tail block handled by Pallas; no jnp.pad copy

    resident = lambda a: pl.BlockSpec(a.shape, lambda i: (0, 0))  # VMEM-resident

    out = pl.pallas_call(
        qnet_kernel,
        out_shape=jax.ShapeDtypeStruct((B, ACTION_DIM), jnp.float32),
        grid=grid,
        in_specs=[
            pl.BlockSpec((tb, STATE_DIM), lambda i: (i, 0)),   # x: tiled over batch
            resident(w1), resident(b1),
            resident(w2), resident(b2),
            resident(w3), resident(b3),
        ],
        out_specs=pl.BlockSpec((tb, ACTION_DIM), lambda i: (i, 0)),
        compiler_params=pltpu.CompilerParams(
            dimension_semantics=("parallel",),                 # megacore sharding on v7x
        ),
    )(x, w1, b1, w2, b2, w3, b3)
    return out


def init_params(key, dtype=jnp.float32):
    """Deterministic init mimicking PyTorch Linear default U(-1/sqrt(fan_in), 1/sqrt(fan_in)).

    Weights are stored (in_dim, out_dim) so the kernel computes x @ W + b, equivalent
    to torch's x @ W.T + b.  Pass dtype=jnp.bfloat16 on v6e/v7x for bf16 MXU matmuls
    (f32 accumulation is preserved inside the kernel)."""
    def linear(key, fan_in, fan_out):
        kw, kb = jax.random.split(key)
        bound = 1.0 / jnp.sqrt(fan_in)
        w = jax.random.uniform(kw, (fan_in, fan_out), jnp.float32, -bound, bound)
        b = jax.random.uniform(kb, (1, fan_out), jnp.float32, -bound, bound)
        return w.astype(dtype), b.astype(dtype)

    k1, k2, k3 = jax.random.split(key, 3)
    w1, b1 = linear(k1, STATE_DIM, HIDDEN_DIM1)
    w2, b2 = linear(k2, HIDDEN_DIM1, HIDDEN_DIM2)
    w3, b3 = linear(k3, HIDDEN_DIM2, ACTION_DIM)
    return w1, b1, w2, b2, w3, b3


def reference_forward(x, params):
    w1, b1, w2, b2, w3, b3 = [p.astype(jnp.float32) for p in params]
    h1 = jnp.maximum(x @ w1 + b1, 0.0)
    h2 = jax.nn.sigmoid(h1 @ w2 + b2)
    return h2 @ w3 + b3


if __name__ == "__main__":
    key = jax.random.PRNGKey(0)
    kx, kx2, kp = jax.random.split(key, 3)
    params = init_params(kp)  # f32 params -> exact match of the PyTorch module math

    # small serving-style batch (single 8-row tile, masked tail-free)
    batch = 8
    x = jax.random.normal(kx, (batch, STATE_DIM), jnp.float32)
    out = jax.block_until_ready(qnet_forward(x, params))
    ref = reference_forward(x, params)
    assert out.shape == (batch, ACTION_DIM)
    assert jnp.allclose(out, ref, atol=1e-5, rtol=1e-4), "mismatch vs reference (B=8)"

    # larger batch exercising a 2-step grid with a partial tail block
    batch2 = 1000
    x2 = jax.random.normal(kx2, (batch2, STATE_DIM), jnp.float32)
    out2 = jax.block_until_ready(qnet_forward(x2, params))
    ref2 = reference_forward(x2, params)
    assert out2.shape == (batch2, ACTION_DIM)
    assert jnp.allclose(out2, ref2, atol=1e-5, rtol=1e-4), "mismatch vs reference (B=1000)"

    print("KERNEL_OK")
</pallas_src>

<mosaic_0001>
module attributes {stable_mosaic.version = 11 : i64} {
  func.func @qnet_kernel(%arg0: i32, %arg1: memref<8x32xf32, #tpu.memory_space<vmem>>, %arg2: memref<32x128xf32, #tpu.memory_space<vmem>>, %arg3: memref<1x128xf32, #tpu.memory_space<vmem>>, %arg4: memref<128x128xf32, #tpu.memory_space<vmem>>, %arg5: memref<1x128xf32, #tpu.memory_space<vmem>>, %arg6: memref<128x4xf32, #tpu.memory_space<vmem>>, %arg7: memref<1x4xf32, #tpu.memory_space<vmem>>, %arg8: memref<8x4xf32, #tpu.memory_space<vmem>>) attributes {dimension_semantics = [#tpu.dimension_semantics<parallel>], iteration_bounds = array<i64: 1>, scalar_prefetch = 0 : i64, scratch_operands = 0 : i64, tpu.core_type = #tpu.core_type<tc>, window_params = [{transform_indices = @transform_0, window_bounds = array<i64: 8, 32>}, {pipeline_mode = #tpu.pipeline_mode<synchronous>, transform_indices = @transform_1, window_bounds = array<i64: 32, 128>}, {pipeline_mode = #tpu.pipeline_mode<synchronous>, transform_indices = @transform_2, window_bounds = array<i64: 1, 128>}, {pipeline_mode = #tpu.pipeline_mode<synchronous>, transform_indices = @transform_3, window_bounds = array<i64: 128, 128>}, {pipeline_mode = #tpu.pipeline_mode<synchronous>, transform_indices = @transform_4, window_bounds = array<i64: 1, 128>}, {pipeline_mode = #tpu.pipeline_mode<synchronous>, transform_indices = @transform_5, window_bounds = array<i64: 128, 4>}, {pipeline_mode = #tpu.pipeline_mode<synchronous>, transform_indices = @transform_6, window_bounds = array<i64: 1, 4>}, {transform_indices = @transform_7, window_bounds = array<i64: 8, 4>}]} {
    %c0 = arith.constant 0 : index
    %c0_0 = arith.constant 0 : index
    %0 = vector.load %arg1[%c0, %c0_0] : memref<8x32xf32, #tpu.memory_space<vmem>>, vector<8x32xf32>
    %c0_1 = arith.constant 0 : index
    %c0_2 = arith.constant 0 : index
    %1 = vector.load %arg2[%c0_1, %c0_2] : memref<32x128xf32, #tpu.memory_space<vmem>>, vector<32x128xf32>
    %cst = arith.constant dense<0.000000e+00> : vector<8x128xf32>
    %2 = tpu.matmul %0, %1, %cst {dimension_numbers = #tpu.dot_dimension_numbers<[1], [0], [0], [1], [0, 0, 1, 1], [], []>} : vector<8x32xf32>, vector<32x128xf32>, vector<8x128xf32> -> vector<8x128xf32>
    %c0_3 = arith.constant 0 : index
    %c0_4 = arith.constant 0 : index
    %3 = vector.load %arg3[%c0_3, %c0_4] : memref<1x128xf32, #tpu.memory_space<vmem>>, vector<1x128xf32>
    %4 = vector.broadcast %3 : vector<1x128xf32> to vector<8x128xf32>
    %5 = arith.addf %2, %4 : vector<8x128xf32>
    %cst_5 = arith.constant 0.000000e+00 : f32
    %6 = vector.broadcast %cst_5 : f32 to vector<8x128xf32>
    %7 = arith.maximumf %5, %6 : vector<8x128xf32>
    %c0_6 = arith.constant 0 : index
    %c0_7 = arith.constant 0 : index
    %8 = vector.load %arg4[%c0_6, %c0_7] : memref<128x128xf32, #tpu.memory_space<vmem>>, vector<128x128xf32>
    %cst_8 = arith.constant dense<0.000000e+00> : vector<8x128xf32>
    %9 = tpu.matmul %7, %8, %cst_8 {dimension_numbers = #tpu.dot_dimension_numbers<[1], [0], [0], [1], [0, 0, 1, 1], [], []>} : vector<8x128xf32>, vector<128x128xf32>, vector<8x128xf32> -> vector<8x128xf32>
    %c0_9 = arith.constant 0 : index
    %c0_10 = arith.constant 0 : index
    %10 = vector.load %arg5[%c0_9, %c0_10] : memref<1x128xf32, #tpu.memory_space<vmem>>, vector<1x128xf32>
    %11 = vector.broadcast %10 : vector<1x128xf32> to vector<8x128xf32>
    %12 = arith.addf %9, %11 : vector<8x128xf32>
    %cst_11 = arith.constant 5.000000e-01 : f32
    %13 = vector.broadcast %cst_11 : f32 to vector<8x128xf32>
    %14 = arith.mulf %13, %12 : vector<8x128xf32>
    %15 = math.tanh %14 : vector<8x128xf32>
    %cst_12 = arith.constant 1.000000e+00 : f32
    %16 = vector.broadcast %cst_12 : f32 to vector<8x128xf32>
    %17 = arith.addf %15, %16 : vector<8x128xf32>
    %cst_13 = arith.constant 5.000000e-01 : f32
    %18 = vector.broadcast %cst_13 : f32 to vector<8x128xf32>
    %19 = arith.mulf %18, %17 : vector<8x128xf32>
    %c0_14 = arith.constant 0 : index
    %c0_15 = arith.constant 0 : index
    %20 = vector.load %arg6[%c0_14, %c0_15] : memref<128x4xf32, #tpu.memory_space<vmem>>, vector<128x4xf32>
    %cst_16 = arith.constant dense<0.000000e+00> : vector<8x4xf32>
    %21 = tpu.matmul %19, %20, %cst_16 {dimension_numbers = #tpu.dot_dimension_numbers<[1], [0], [0], [1], [0, 0, 1, 1], [], []>} : vector<8x128xf32>, vector<128x4xf32>, vector<8x4xf32> -> vector<8x4xf32>
    %c0_17 = arith.constant 0 : index
    %c0_18 = arith.constant 0 : index
    %22 = vector.load %arg7[%c0_17, %c0_18] : memref<1x4xf32, #tpu.memory_space<vmem>>, vector<1x4xf32>
    %23 = vector.broadcast %22 : vector<1x4xf32> to vector<8x4xf32>
    %24 = arith.addf %21, %23 : vector<8x4xf32>
    %c0_19 = arith.constant 0 : index
    %c0_20 = arith.constant 0 : index
    %25 = vector.load %arg8[%c0_19, %c0_20] : memref<8x4xf32, #tpu.memory_space<vmem>>, vector<8x4xf32>
    tpu.vector_store %arg8[%c0_19, %c0_20], %24 {strides = array<i32>} : memref<8x4xf32, #tpu.memory_space<vmem>>, vector<8x4xf32>,
    return
  }
  func.func @transform_0(%arg0: i32) -> (i32, i32) {
    %c0_i32 = arith.constant 0 : i32
    %c0_i32_0 = arith.constant 0 : i32
    return %arg0, %c0_i32 : i32, i32
  }
  func.func @transform_1(%arg0: i32) -> (i32, i32) {
    %c0_i32 = arith.constant 0 : i32
    %c0_i32_0 = arith.constant 0 : i32
    %c0_i32_1 = arith.constant 0 : i32
    return %c0_i32, %c0_i32_0 : i32, i32
  }
  func.func @transform_2(%arg0: i32) -> (i32, i32) {
    %c0_i32 = arith.constant 0 : i32
    %c0_i32_0 = arith.constant 0 : i32
    %c0_i32_1 = arith.constant 0 : i32
    return %c0_i32, %c0_i32_0 : i32, i32
  }
  func.func @transform_3(%arg0: i32) -> (i32, i32) {
    %c0_i32 = arith.constant 0 : i32
    %c0_i32_0 = arith.constant 0 : i32
    %c0_i32_1 = arith.constant 0 : i32
    return %c0_i32, %c0_i32_0 : i32, i32
  }
  func.func @transform_4(%arg0: i32) -> (i32, i32) {
    %c0_i32 = arith.constant 0 : i32
    %c0_i32_0 = arith.constant 0 : i32
    %c0_i32_1 = arith.constant 0 : i32
    return %c0_i32, %c0_i32_0 : i32, i32
  }
  func.func @transform_5(%arg0: i32) -> (i32, i32) {
    %c0_i32 = arith.constant 0 : i32
    %c0_i32_0 = arith.constant 0 : i32
    %c0_i32_1 = arith.constant 0 : i32
    return %c0_i32, %c0_i32_0 : i32, i32
  }
  func.func @transform_6(%arg0: i32) -> (i32, i32) {
    %c0_i32 = arith.constant 0 : i32
    %c0_i32_0 = arith.constant 0 : i32
    %c0_i32_1 = arith.constant 0 : i32
    return %c0_i32, %c0_i32_0 : i32, i32
  }
  func.func @transform_7(%arg0: i32) -> (i32, i32) {
    %c0_i32 = arith.constant 0 : i32
    %c0_i32_0 = arith.constant 0 : i32
    return %arg0, %c0_i32 : i32, i32
  }
}

</mosaic_0001>

<bundles_post_ra>
// kernel: tpu_custom_call.1
= control target key start
LH: loop header
LB: loop body
LE: loop exit
PB: predicated region body
PF: predicated region fallthrough
CT: control target
= control target key end

     0   :  { %12 = vsyncpa [#allocation3], 0  ;;  %s402_s0 = inlined_call_operand.hbm [shape: f32[8,32], index: 0, kind: input, shape index: {}]   ;;  %s403_s1 = inlined_call_operand.hbm [shape: f32[32,128], index: 1, kind: input, shape index: {}]   ;;  %s404_s2 = inlined_call_operand.vmem [shape: f32[1,128], index: 2, kind: input, shape index: {}]   ;;  %s405_s3 = inlined_call_operand.vmem [shape: f32[128,128], index: 3, kind: input, shape index: {}]   ;;  %s406_s4 = inlined_call_operand.vmem [shape: f32[1,128], index: 4, kind: input, shape index: {}]   ;;  %s407_s5 = inlined_call_operand.vmem [shape: f32[128,4], index: 5, kind: input, shape index: {}]   ;;  %s408_s6 = inlined_call_operand.vmem [shape: f32[1,4], index: 6, kind: input, shape index: {}]   ;;  %s409_s7 = inlined_call_operand.vmem [shape: f32[8,4], index: 7, kind: output, shape index: {}]  }
   0x1   :  { %s19_s26 = sshll.u32 %s402_s0, 4  ;;  %s20_s26 = int_to_ptr.hbm [resolvable:$true] %s19_s26 }
   0x2   :  { %13 = vsyncpa [#allocation5], 0  ;;  %s244_s27 = smov [#allocation2]   ;;  %s29_s8 = sshll.u32 %s403_s1, 4  ;;  %s30_s8 = int_to_ptr.hbm [resolvable:$true] %s29_s8 }
   0x3   :  { %s21_s28 = sshll.u32 %s244_s27, 4  ;;  %s245_s9 = smov [#allocation4]   ;;  %s22_s28 = int_to_ptr.vmem [resolvable:$true] %s21_s28 }
   0x4   :  { %24 = dma.hbm_to_vmem [thread:$0]  %s20_s26, 128, %s22_s28, [#allocation3]  }
   0x5   :  { %s31_s10 = sshll.u32 %s245_s9, 4  ;;  %s246_s11 = smov 128   ;;  %s32_s10 = int_to_ptr.vmem [resolvable:$true] %s31_s10 }
   0x6   :  { %s247_s12 = smov 8  }
   0x7   :  { %37 = dma.hbm_to_vmem [thread:$0]  %s30_s8, 512, %s32_s10, [#allocation5], %s246_s11, %s246_s11, %s247_s12  }
   0x8   :  { %240 = dma.done.wait [#allocation3], 128  }
   0x9   :  { %241 = vsyncadd [#allocation3], 4294967168 }
   0xa   :  { %242 = dma.done.wait [#allocation5], 512  }
   0xb   :  { %243 = vsyncadd [#allocation5], 4294966784  ;;  %v60_v0 = vld [vmem:[#allocation4 + $0x18] sm:$0xff]  ;;  %v59_v1 = vld [vmem:[#allocation4 + $0x10] sm:$0xff]  ;;  %vm65_vm0 = vcmask 261120   ;;  %vm174_vm1 = vcmask 31744  }
   0xc   :  { %81 = vmatpush.msra.mxu0 %v60_v0  ;;  %v105_v2 = vld [vmem:[%s405_s3 + $0x78] sm:$0xff]  ;;  %v58_v3 = vld [vmem:[#allocation4 + $0x8] sm:$0xff]  ;;  %v103_v5 = vld [vmem:[%s405_s3 + $0x68] sm:$0xff] }
   0xd   :  { %110 = vmatpush.msra.mxu1 %v105_v2  ;;  %v104_v4 = vld [vmem:[%s405_s3 + $0x70] sm:$0xff]  ;;  %v57_v6 = vld [vmem:[#allocation4] sm:$0xff]  ;;  %v56_v7 = vld [vmem:[#allocation2] sm:$0xff] }
   0xe   :  { %82 = vmatpush.msra.mxu0 %v59_v1  ;;  %v102_v8 = vld [vmem:[%s405_s3 + $0x60] sm:$0xff]  ;;  %v101_v9 = vld [vmem:[%s405_s3 + $0x58] sm:$0xff]  ;;  %v100_v10 = vld [vmem:[%s405_s3 + $0x50] sm:$0xff] }
   0xf   :  { %111 = vmatpush.msra.mxu1 %v104_v4  ;;  %v99_v11 = vld [vmem:[%s405_s3 + $0x48] sm:$0xff]  ;;  %v98_v12 = vld [vmem:[%s405_s3 + $0x40] sm:$0xff]  ;;  %v97_v13 = vld [vmem:[%s405_s3 + $0x38] sm:$0xff] }
  0x10   :  { %83 = vmatpush.msra.mxu0 %v58_v3  ;;  %v96_v14 = vld [vmem:[%s405_s3 + $0x30] sm:$0xff]  ;;  %v95_v15 = vld [vmem:[%s405_s3 + $0x28] sm:$0xff]  ;;  %v94_v16 = vld [vmem:[%s405_s3 + $0x20] sm:$0xff] }
  0x11   :  { %112 = vmatpush.msra.mxu1 %v103_v5  ;;  %v93_v17 = vld [vmem:[%s405_s3 + $0x18] sm:$0xff]  ;;  %v92_v18 = vld [vmem:[%s405_s3 + $0x10] sm:$0xff]  ;;  %v91_v19 = vld [vmem:[%s405_s3 + $0x8] sm:$0xff] }
  0x12   :  { %84 = vmatpush.msra.mxu0 %v57_v6  ;;  %v90_v20 = vld [vmem:[%s405_s3] sm:$0xff]  ;;  %v149_v21 = vld [vmem:[%s407_s5 + $0x78] sm:$0xff]  ;;  %v148_v22 = vld [vmem:[%s407_s5 + $0x70] sm:$0xff] }
  0x13   :  { %182 = vmatmul.msk.f32.vlgmr.msra.gmra.mxu0 %vm65_vm0, %v56_v7  ;;  %113 = vmatpush.msra.mxu1 %v102_v8  ;;  %v147_v23 = vld [vmem:[%s407_s5 + $0x68] sm:$0xff]  ;;  %v146_v24 = vld [vmem:[%s407_s5 + $0x60] sm:$0xff]  ;;  %v145_v25 = vld [vmem:[%s407_s5 + $0x58] sm:$0xff] }
  0x14   :  { %154 = vmatpush.msra.mxu2 %v149_v21  ;;  %v144_v26 = vld [vmem:[%s407_s5 + $0x50] sm:$0xff]  ;;  %v143_v27 = vld [vmem:[%s407_s5 + $0x48] sm:$0xff]  ;;  %v142_v28 = vld [vmem:[%s407_s5 + $0x40] sm:$0xff] }
  0x15   :  { %114 = vmatpush.msra.mxu1 %v101_v9  ;;  %v187_v29 = vld [vmem:[%s404_s2] ss:$0 sm:$0xff]  ;;  %v141_v33 = vld [vmem:[%s407_s5 + $0x38] sm:$0xff]  ;;  %v140_v34 = vld [vmem:[%s407_s5 + $0x30] sm:$0xff] }
  0x16   :  { %155 = vmatpush.msra.mxu2 %v148_v22  ;;  %v139_v35 = vld [vmem:[%s407_s5 + $0x28] sm:$0xff]  ;;  %v138_v36 = vld [vmem:[%s407_s5 + $0x20] sm:$0xff]  ;;  %v137_v37 = vld [vmem:[%s407_s5 + $0x18] sm:$0xff] }
  0x17   :  { %115 = vmatpush.msra.mxu1 %v100_v10  ;;  %v136_v38 = vld [vmem:[%s407_s5 + $0x10] sm:$0xff]  ;;  %v135_v39 = vld [vmem:[%s407_s5 + $0x8] sm:$0xff]  ;;  %v134_v40 = vld [vmem:[%s407_s5] sm:$0xff] }
  0x18   :  { %156 = vmatpush.msra.mxu2 %v147_v23  ;;  %v188_v41 = vld [vmem:[%s406_s4] ss:$0 sm:$0xff] }
  0x19   :  { %116 = vmatpush.msra.mxu1 %v99_v11  ;;  %v189_v48 = vld [vmem:[%s408_s6] ss:$0 sm:$0xff] }
  0x1a   :  { %157 = vmatpush.msra.mxu2 %v146_v24 }
  0x1b   :  { %117 = vmatpush.msra.mxu1 %v98_v12 }
  0x1c   :  { %158 = vmatpush.msra.mxu2 %v145_v25 }
  0x1d   :  { %118 = vmatpush.msra.mxu1 %v97_v13 }
  0x1e   :  { %159 = vmatpush.msra.mxu2 %v144_v26 }
  0x1f   :  { %119 = vmatpush.msra.mxu1 %v96_v14 }
  0x20   :  { %160 = vmatpush.msra.mxu2 %v143_v27 }
  0x21   :  { %120 = vmatpush.msra.mxu1 %v95_v15 }
  0x22   :  { %161 = vmatpush.msra.mxu2 %v142_v28 }
  0x23   :  { %121 = vmatpush.msra.mxu1 %v94_v16 }
  0x24   :  { %162 = vmatpush.msra.mxu2 %v141_v33 }
  0x25   :  { %122 = vmatpush.msra.mxu1 %v93_v17 }
  0x26   :  { %163 = vmatpush.msra.mxu2 %v140_v34 }
  0x27   :  { %123 = vmatpush.msra.mxu1 %v92_v18 }
  0x28   :  { %164 = vmatpush.msra.mxu2 %v139_v35 }
  0x29   :  { %124 = vmatpush.msra.mxu1 %v91_v19 }
  0x2a   :  { %165 = vmatpush.msra.mxu2 %v138_v36 }
  0x2b   :  { %125 = vmatpush.msra.mxu1 %v90_v20 }
  0x2c   :  { %166 = vmatpush.msra.mxu2 %v137_v37 }
  0x2e   :  { %167 = vmatpush.msra.mxu2 %v136_v38 }
  0x30   :  { %168 = vmatpush.msra.mxu2 %v135_v39 }
  0x32   :  { %169 = vmatpush.msra.mxu2 %v134_v40 }
  0x90   :  { %v86_v30 = vpop.f32.mrf.mxu0 }
  0x91   :  { %v87_v31 = vadd.f32 %v187_v29, %v86_v30 }
  0x93   :  { %v89_v32 = vmax.f32 %v87_v31, 0.0 }
  0x95   :  { %126 = vmatmul.f32.vlgmr.msra.gmra.mxu1 %v89_v32 }
 0x112   :  { %v127_v42 = vpop.f32.mrf.mxu1 }
 0x113   :  { %v128_v43 = vadd.f32 %v188_v41, %v127_v42 }
 0x115   :  { %v130_v44 = vmul.f32 0.5, %v128_v43 }
 0x117   :  { %190 = vtanh.f32 %v130_v44 }
 0x11d   :  { %v191_v45 = vpop.eup %190 }
 0x11e   :  { %v132_v46 = vadd.f32 1.0, %v191_v45 }
 0x120   :  { %v133_v47 = vmul.f32 0.5, %v132_v46 }
 0x122   :  { %170 = vmatmul.f32.vlgmr.msra.gmra.mxu2 %v133_v47 }
 0x1a5   :  { %v171_v49 = vpop.f32.mrf.mxu2 }
 0x1a6   :  { %v172_v50 = vadd.f32 %v189_v48, %v171_v49 }
 0x1a8   :  { %175 = vst.msk [vmem:[%s409_s7] sm:$0xff] %vm174_vm1, %v172_v50 }
 0x1a9   :  { %180 = vsyncpa [#allocation3], 1 }
 0x1aa   :  { %181 = vsyncpa [#allocation5], 1 }

</bundles_post_ra>
